<compile_context>
chip_gen: v7x
topology: tpu7x:2x2x1
jax: 0.10.0
libtpu: 0.0.40
codegen_flags: <defaults>
</compile_context>

<pallas_src>
import math

import jax
import jax.numpy as jnp
from jax.experimental import pallas as pl
from jax.experimental.pallas import tpu as pltpu


_LANE = 128
_GRIDLESS_MAX_BYTES = 1 << 20       # slabs <= 1 MiB: single VMEM block, no grid
_BLOCK_VMEM_BUDGET = 8 << 20        # live block-buffer budget per grid step
_INTERMEDIATE_FACTOR = 6            # in+out double-buffered + f32 upcast + exp temp
_MIN_PIPELINE_STEPS = 4             # keep the DMA pipeline busy / feed v7x megacore


def _softmax_dim0_kernel(x_ref, o_ref):
    # Numerically-stable softmax over axis 0 of the (N, R, 128) lane-dense
    # tile.  The reduction axis (N) spans whole vregs, so max/sum are pure
    # element-wise VPU ops (no cross-sublane XLU work) and the broadcast of
    # max/sum back over N is free; exp rides the EUP slot.  Exact division
    # keeps columns summing to 1 at f32 precision (parity with F.softmax).
    x = x_ref[...].astype(jnp.float32)
    m = jnp.max(x, axis=0, keepdims=True)
    e = jnp.exp(x - m)
    s = jnp.sum(e, axis=0, keepdims=True)
    o_ref[...] = (e / s).astype(o_ref.dtype)


def _round_down_to(v, m):
    return max(m, (v // m) * m)


def softmax_dim0(x):
    """Softmax over dim 0, matching torch.nn.functional.softmax(x, dim=0)."""
    orig_shape = x.shape
    n = x.shape[0]
    d = math.prod(x.shape[1:]) if x.ndim > 1 else 1

    dtype_bytes = jnp.dtype(x.dtype).itemsize
    sublane_pack = max(8, 32 // dtype_bytes)   # 8 f32 / 16 bf16 / 32 int8

    # Lane-dense packing: pad the flattened non-reduction axis to a multiple
    # of 128.  Pad value is irrelevant — softmax columns are independent over
    # axis 0 and the padded columns are sliced away after the kernel.
    d_pad = ((d + _LANE - 1) // _LANE) * _LANE
    x2 = x.reshape(n, d)
    if d_pad != d:
        x2 = jnp.pad(x2, ((0, 0), (0, d_pad - d)))
    r = d_pad // _LANE
    x3 = x2.reshape(n, r, _LANE)

    slab_bytes = n * r * _LANE * dtype_bytes
    cost = pl.CostEstimate(
        flops=5 * n * d_pad,            # sub, max, sum, div (memory-bound anyway)
        transcendentals=n * d_pad,      # one exp per element
        bytes_accessed=2 * slab_bytes,  # read + write
    )

    if slab_bytes <= _GRIDLESS_MAX_BYTES:
        # Tiny slab: one VMEM block, no pointless grid loop.
        out3 = pl.pallas_call(
            _softmax_dim0_kernel,
            out_shape=jax.ShapeDtypeStruct((n, r, _LANE), x.dtype),
            cost_estimate=cost,
        )(x3)
    else:
        # Byte-budget-derived tile size: block bytes scale with n, so derive
        # the packed-row tile from a VMEM budget instead of a fixed count.
        tr = _BLOCK_VMEM_BUDGET // (n * _LANE * dtype_bytes * _INTERMEDIATE_FACTOR)
        tr = min(tr, 2048)
        # Keep >= ~4 pipeline steps so double-buffering can hide the DMA and
        # the "parallel" axis has work for both TensorCores on v7x.
        tr = min(tr, (r + _MIN_PIPELINE_STEPS - 1) // _MIN_PIPELINE_STEPS)
        tr = _round_down_to(tr, sublane_pack)
        tr = min(tr, r)  # tr == r (full extent) is always a legal block dim

        out3 = pl.pallas_call(
            _softmax_dim0_kernel,
            out_shape=jax.ShapeDtypeStruct((n, r, _LANE), x.dtype),
            grid=(pl.cdiv(r, tr),),
            in_specs=[pl.BlockSpec((n, tr, _LANE), lambda i: (0, i, 0))],
            out_specs=pl.BlockSpec((n, tr, _LANE), lambda i: (0, i, 0)),
            compiler_params=pltpu.CompilerParams(
                dimension_semantics=("parallel",),
                vmem_limit_bytes=32 * 1024 * 1024,
            ),
            cost_estimate=cost,
        )(x3)

    out2 = out3.reshape(n, d_pad)
    if d_pad != d:
        out2 = out2[:, :d]
    return out2.reshape(orig_shape)


if __name__ == "__main__":
    # Small NCHW input, consistent with the module's generic forward.
    key = jax.random.PRNGKey(0)
    x = jax.random.normal(key, (2, 4, 16, 16), dtype=jnp.float32)

    out = jax.block_until_ready(softmax_dim0(x))
    ref = jax.nn.softmax(x, axis=0)
    assert out.shape == x.shape
    assert out.dtype == x.dtype
    assert jnp.allclose(out, ref, atol=1e-5, rtol=1e-5)

    # Also exercise the pad-to-128 path (flattened feature dim not a
    # multiple of 128).
    x_odd = jax.random.normal(jax.random.PRNGKey(1), (3, 5, 7), dtype=jnp.float32)
    out_odd = jax.block_until_ready(softmax_dim0(x_odd))
    ref_odd = jax.nn.softmax(x_odd, axis=0)
    assert out_odd.shape == x_odd.shape
    assert jnp.allclose(out_odd, ref_odd, atol=1e-5, rtol=1e-5)

    print("KERNEL_OK")
</pallas_src>

<mosaic_0001>
module attributes {stable_mosaic.version = 11 : i64} {
  func.func @_softmax_dim0_kernel(%arg0: memref<2x8x128xf32, #tpu.memory_space<vmem>>, %arg1: memref<2x8x128xf32, #tpu.memory_space<vmem>>) attributes {dimension_semantics = [], scalar_prefetch = 0 : i64, scratch_operands = 0 : i64, tpu.core_type = #tpu.core_type<tc>} {
    %c0 = arith.constant 0 : index
    %c0_0 = arith.constant 0 : index
    %c0_1 = arith.constant 0 : index
    %0 = vector.load %arg0[%c0, %c0_0, %c0_1] : memref<2x8x128xf32, #tpu.memory_space<vmem>>, vector<2x8x128xf32>
    %cst = arith.constant dense<0xFF800000> : vector<8x128xf32>
    %1 = vector.multi_reduction <maximumf>, %0, %cst [0] : vector<2x8x128xf32> to vector<8x128xf32>
    %2 = vector.shape_cast %1 : vector<8x128xf32> to vector<1x8x128xf32>
    %3 = vector.broadcast %2 : vector<1x8x128xf32> to vector<2x8x128xf32>
    %4 = arith.subf %0, %3 : vector<2x8x128xf32>
    %5 = math.exp %4 : vector<2x8x128xf32>
    %cst_2 = arith.constant dense<0.000000e+00> : vector<8x128xf32>
    %6 = vector.multi_reduction <add>, %5, %cst_2 [0] : vector<2x8x128xf32> to vector<8x128xf32>
    %7 = vector.shape_cast %6 : vector<8x128xf32> to vector<1x8x128xf32>
    %8 = vector.broadcast %7 : vector<1x8x128xf32> to vector<2x8x128xf32>
    %9 = arith.divf %5, %8 : vector<2x8x128xf32>
    %c0_3 = arith.constant 0 : index
    %c0_4 = arith.constant 0 : index
    %c0_5 = arith.constant 0 : index
    %10 = vector.load %arg1[%c0_3, %c0_4, %c0_5] : memref<2x8x128xf32, #tpu.memory_space<vmem>>, vector<2x8x128xf32>
    tpu.vector_store %arg1[%c0_3, %c0_4, %c0_5], %9 {strides = array<i32>} : memref<2x8x128xf32, #tpu.memory_space<vmem>>, vector<2x8x128xf32>,
    return
  }
}

</mosaic_0001>

<bundles_post_ra>
// kernel: tpu_custom_call.1
= control target key start
LH: loop header
LB: loop body
LE: loop exit
PB: predicated region body
PF: predicated region fallthrough
CT: control target
= control target key end

     0   :  { %6 = vsyncpa [#allocation3], 0  ;;  %s157_s0 = inlined_call_operand.hbm [shape: f32[2,8,128], index: 0, kind: input, shape index: {}]   ;;  %s158_s1 = inlined_call_operand.hbm [shape: f32[2,8,128], index: 1, kind: output, shape index: {}]  }
   0x1   :  { %7 = vsyncpa [#allocation4], 0  ;;  %s113_s6 = smov [#allocation2]   ;;  %s65_s10 = scalar_lea.hbm %s157_s0, 256 }
   0x2   :  { %s13_s7 = sshll.u32 %s113_s6, 4  ;;  %p66_p0 = scmp.ne.s32.totalorder %s157_s0, %s65_s10  ;;  %s14_s7 = int_to_ptr.vmem [resolvable:$true] %s13_s7 }
   0x3   :  { %p69_p1 = scmp.lt.u32.totalorder %s65_s10, %s157_s0 }
   0x5   :  { %p71_p2 = pnand %p69_p1, %p66_p0 }
   0x7   :  { %74 = shalt.err (!%p71_p2)
}
   0x8   :  { %s75_s15 = scalar_lea.vmem %s14_s7, 256  ;;  %p80_p4 = scmp.lt.s32.totalorder %s14_s7, %s14_s7 }
   0x9   :  { %p76_p3 = scmp.ne.s32.totalorder %s14_s7, %s75_s15  ;;  %p81_p5 = scmp.lt.s32.totalorder %s75_s15, %s75_s15 }
   0xb   :  { %p82_p6 = por %p81_p5, %p80_p4 }
   0xd   :  { %p83_p7 = pnand %p82_p6, %p76_p3 }
   0xf   :  { %86 = shalt.err (!%p83_p7)
}
  0x10   :  { %s114_s16 = smov 128   ;;  %s115_s17 = smov 8  }
  0x11   :  { %19 = dma.hbm_to_vmem [thread:$0]  %s157_s0, 256, %s14_s7, [#allocation3], %s114_s16, %s114_s16, %s115_s17  }
  0x12   :  { %109 = dma.done.wait [#allocation3], 256  }
  0x13   :  { %110 = vsyncadd [#allocation3], 4294967040  ;;  %v23_v0 = vld [vmem:[#allocation2] sm:$0xff]  ;;  %v24_v1 = vld [vmem:[#allocation2 + $0x8] sm:$0xff]  ;;  %s116_s20 = smov [#allocation5]  }
  0x14   :  { %v25_v2 = vmax.f32 %v23_v0, %v24_v1  ;;  %s43_s21 = sshll.u32 %s116_s20, 4  ;;  %s44_s21 = int_to_ptr.vmem [resolvable:$true] %s43_s21 }
  0x15   :  { %s87_s0 = scalar_lea.vmem %s44_s21, 256  ;;  %p92_p9 = scmp.lt.s32.totalorder %s44_s21, %s44_s21 }
  0x16   :  { %v26_v3 = vsub.f32 %v23_v0, %v25_v2  ;;  %v27_v4 = vsub.f32 %v24_v1, %v25_v2  ;;  %p88_p8 = scmp.ne.s32.totalorder %s44_s21, %s87_s0  ;;  %p93_p10 = scmp.lt.s32.totalorder %s87_s0, %s87_s0 }
  0x18   :  { %v28_v5 = vmul.f32 1.442695, %v26_v3  ;;  %v30_v6 = vmul.f32 1.442695, %v27_v4  ;;  %p94_p11 = por %p93_p10, %p92_p9 }
  0x1a   :  { %59 = vpow2.f32 %v28_v5  ;;  %p95_p12 = pnand %p94_p11, %p88_p8 }
  0x1b   :  { %61 = vpow2.f32 %v30_v6 }
  0x24   :  { %v60_v7 = vpop.eup %59 }
  0x25   :  { %v62_v8 = vpop.eup %61 }
  0x26   :  { %v32_v9 = vadd.f32 %v62_v8, %v60_v7 }
  0x28   :  { %63 = vrcp.f32 %v32_v9 }
  0x32   :  { %v64_v10 = vpop.eup %63 }
  0x33   :  { %v34_v11 = vmul.f32 %v64_v10, %v60_v7  ;;  %v35_v12 = vmul.f32 %v64_v10, %v62_v8 }
  0x35   :  { %36 = vst [vmem:[#allocation5] sm:$0xff] %v34_v11  ;;  %37 = vst [vmem:[#allocation5 + $0x8] sm:$0xff] %v35_v12 }
  0x36   :  { %98 = shalt.err (!%p95_p12)
}
  0x37   :  { %s99_s24 = scalar_lea.hbm %s158_s1, 256 }
  0x38   :  { %p100_p13 = scmp.ne.s32.totalorder %s158_s1, %s99_s24  ;;  %p103_p0 = scmp.lt.u32.totalorder %s99_s24, %s158_s1 }
  0x3a   :  { %p105_p1 = pnand %p103_p0, %p100_p13 }
  0x3c   :  { %108 = shalt.err (!%p105_p1)
}
  0x3d   :  { %49 = dma.vmem_to_hbm [thread:$0]  %s44_s21, 256, %s158_s1, [#allocation4], %s114_s16, %s114_s16, %s115_s17  }
  0x3e   :  { %111 = dma.done.wait [#allocation4], 256  }
  0x3f   :  { %112 = vsyncadd [#allocation4], 4294967040 }
  0x40   :  { %53 = vsyncpa [#allocation3], 1 }
  0x41   :  { %54 = vsyncpa [#allocation4], 1 }

</bundles_post_ra>
